<compile_context>
chip_gen: v7x
topology: tpu7x:2x2x1
jax: 0.10.0
libtpu: 0.0.40
codegen_flags: <defaults>
</compile_context>

<pallas_src>
import functools

import jax
import jax.numpy as jnp
from jax import lax
from jax.experimental import pallas as pl
from jax.experimental.pallas import tpu as pltpu

EPS = 1e-5


def _predictor_kernel(x_ref, w1_ref, w2_ref, w3_ref, bn_ref, o_ref, h1_ref,
                      *, batch, tile_b):
    i = pl.program_id(0)
    last = pl.num_programs(0) - 1

    # ---- streamed fc1 (bias dropped: exactly cancelled by BN1 mean-sub) ----
    start = pl.multiple_of(i * tile_b, tile_b)
    h1_ref[pl.ds(start, tile_b), :] = jnp.dot(
        x_ref[...], w1_ref[...], preferred_element_type=jnp.float32)

    # ---- epilogue: BN1+relu, fc2, BN2+relu, fc3 over the whole batch -------
    @pl.when(i == last)
    def _():
        bnp = bn_ref[...]                      # (8, 128) packed BN/bias tile
        h1 = h1_ref[...]                       # (B_pad, 128) f32
        b_pad = h1.shape[0]

        row = lax.broadcasted_iota(jnp.int32, (b_pad, 1), 0)
        valid = row < batch                    # mask padded rows out of stats
        inv_b = 1.0 / batch

        # BatchNorm1d(128): training-mode batch stats, fused affine, relu.
        mu1 = jnp.sum(jnp.where(valid, h1, 0.0), axis=0, keepdims=True) * inv_b
        d1 = jnp.where(valid, h1 - mu1, 0.0)
        var1 = jnp.sum(d1 * d1, axis=0, keepdims=True) * inv_b
        scale1 = bnp[0:1, :] * lax.rsqrt(var1 + EPS)
        shift1 = bnp[1:2, :] - mu1 * scale1
        a1 = jnp.maximum(h1 * scale1 + shift1, 0.0)

        # fc2 (bias dropped), bf16 operands on the MXU, f32 accumulation.
        h2 = jnp.dot(a1.astype(jnp.bfloat16), w2_ref[...],
                     preferred_element_type=jnp.float32)       # (B_pad, 64)

        # BatchNorm1d(64) + relu.
        mu2 = jnp.sum(jnp.where(valid, h2, 0.0), axis=0, keepdims=True) * inv_b
        d2 = jnp.where(valid, h2 - mu2, 0.0)
        var2 = jnp.sum(d2 * d2, axis=0, keepdims=True) * inv_b
        scale2 = bnp[2:3, :64] * lax.rsqrt(var2 + EPS)
        shift2 = bnp[3:4, :64] - mu2 * scale2
        a2 = jnp.maximum(h2 * scale2 + shift2, 0.0)

        # fc3 (64 -> 2) keeps its bias (no BN after it in forward()).
        logits = jnp.dot(a2.astype(jnp.bfloat16), w3_ref[...],
                         preferred_element_type=jnp.float32) + bnp[4:5, :2]
        o_ref[...] = logits[:batch].astype(o_ref.dtype)


def predictor_forward(x, params, *, tile_b=256):
    """x: (B, 1152).  Returns (B, 2) float32 logits (training-mode BN)."""
    (w1, b1, g1, be1, w2, b2, g2, be2, w3, b3) = params
    del b1, b2  # exactly cancelled by BatchNorm batch-mean subtraction

    B, D = x.shape
    assert D == 1152

    # Batch tile: multiple of 8 sublanes, capped at `tile_b`.
    TILE_B = max(8, min(int(tile_b), ((B + 7) // 8) * 8))
    TILE_B = (TILE_B // 8) * 8
    num_tiles = (B + TILE_B - 1) // TILE_B
    B_pad = num_tiles * TILE_B
    if B_pad != B:
        x = jnp.pad(x, ((0, B_pad - B), (0, 0)))

    # bf16 matmul operands (halves the dominant w1/x HBM traffic; MXU-native).
    xb = x.astype(jnp.bfloat16)
    w1b = w1.astype(jnp.bfloat16)
    w2b = w2.astype(jnp.bfloat16)
    w3b = w3.astype(jnp.bfloat16)

    # Pack the small per-feature vectors into a single (8, 128) f32 tile:
    #   row 0: gamma1  row 1: beta1  row 2: gamma2[:64]  row 3: beta2[:64]
    #   row 4: fc3 bias[:2]          rows 5-7: unused
    bn = jnp.zeros((8, 128), jnp.float32)
    bn = bn.at[0, :].set(g1.reshape(-1).astype(jnp.float32))
    bn = bn.at[1, :].set(be1.reshape(-1).astype(jnp.float32))
    bn = bn.at[2, :64].set(g2.reshape(-1).astype(jnp.float32))
    bn = bn.at[3, :64].set(be2.reshape(-1).astype(jnp.float32))
    bn = bn.at[4, :2].set(b3.reshape(-1).astype(jnp.float32))

    kernel = functools.partial(_predictor_kernel, batch=B, tile_b=TILE_B)

    grid_spec = pltpu.PrefetchScalarGridSpec(
        num_scalar_prefetch=0,
        grid=(num_tiles,),
        in_specs=[
            pl.BlockSpec((TILE_B, 1152), lambda i: (i, 0)),   # x: streamed
            pl.BlockSpec((1152, 128), lambda i: (0, 0)),      # w1: resident
            pl.BlockSpec((128, 64), lambda i: (0, 0)),        # w2: resident
            pl.BlockSpec((64, 2), lambda i: (0, 0)),          # w3: resident
            pl.BlockSpec((8, 128), lambda i: (0, 0)),         # packed BN/bias
        ],
        out_specs=pl.BlockSpec((B, 2), lambda i: (0, 0)),     # written at last step
        scratch_shapes=[pltpu.VMEM((B_pad, 128), jnp.float32)],
    )

    return pl.pallas_call(
        kernel,
        out_shape=jax.ShapeDtypeStruct((B, 2), jnp.float32),
        grid_spec=grid_spec,
        compiler_params=pltpu.CompilerParams(
            dimension_semantics=("arbitrary",),
            vmem_limit_bytes=32 * 1024 * 1024,
        ),
    )(xb, w1b, w2b, w3b, bn)


def init_params(key):
    """Deterministic synthetic parameters matching the module's shapes."""
    ks = jax.random.split(key, 6)

    def lin(kw, kb, fan_in, fan_out):
        w = jax.random.normal(kw, (fan_in, fan_out), jnp.float32) / jnp.sqrt(fan_in)
        b = jax.random.normal(kb, (1, fan_out), jnp.float32) * 0.01
        return w, b

    w1, b1 = lin(ks[0], ks[1], 1152, 128)
    w2, b2 = lin(ks[2], ks[3], 128, 64)
    w3, b3 = lin(ks[4], ks[5], 64, 2)

    # BatchNorm affine params, deterministically perturbed so the path is live.
    g1 = (1.0 + 0.1 * jnp.cos(jnp.arange(128, dtype=jnp.float32))).reshape(1, 128)
    be1 = (0.05 * jnp.sin(jnp.arange(128, dtype=jnp.float32))).reshape(1, 128)
    g2 = (1.0 + 0.1 * jnp.cos(jnp.arange(64, dtype=jnp.float32))).reshape(1, 64)
    be2 = (0.05 * jnp.sin(jnp.arange(64, dtype=jnp.float32))).reshape(1, 64)

    return (w1, b1, g1, be1, w2, b2, g2, be2, w3, b3)


def reference_forward(x, params):
    """Pure-JAX reference: full PyTorch math (incl. fc1/fc2 biases) with the
    same bf16-matmul / f32-BN dtype strategy as the kernel."""
    (w1, b1, g1, be1, w2, b2, g2, be2, w3, b3) = params

    def dot(a, w):
        return jnp.dot(a.astype(jnp.bfloat16), w.astype(jnp.bfloat16),
                       preferred_element_type=jnp.float32)

    def bn(h, g, be):
        mu = jnp.mean(h, axis=0, keepdims=True)
        var = jnp.mean((h - mu) ** 2, axis=0, keepdims=True)   # biased var
        return (h - mu) * lax.rsqrt(var + EPS) * g + be

    h = jnp.maximum(bn(dot(x, w1) + b1, g1, be1), 0.0)
    h = jnp.maximum(bn(dot(h, w2) + b2, g2, be2), 0.0)
    return dot(h, w3) + b3


if __name__ == "__main__":
    key = jax.random.PRNGKey(0)
    k_x, k_p = jax.random.split(key)

    B = 16  # small batch; with tile_b=8 the streamed-fc1 grid runs 2 steps
    x = jax.random.normal(k_x, (B, 1152), jnp.float32)
    params = init_params(k_p)

    out = predictor_forward(x, params, tile_b=8)
    out = jax.block_until_ready(out)

    ref = reference_forward(x, params)
    assert out.shape == (B, 2)
    max_diff = float(jnp.max(jnp.abs(out - ref)))
    assert jnp.allclose(out, ref, atol=2e-2, rtol=2e-2), (
        f"mismatch vs reference: max abs diff {max_diff}")

    print("KERNEL_OK")
</pallas_src>

<mosaic_0001>
module attributes {stable_mosaic.version = 11 : i64} {
  func.func @_predictor_kernel(%arg0: i32, %arg1: memref<8x1152xbf16, #tpu.memory_space<vmem>>, %arg2: memref<1152x128xbf16, #tpu.memory_space<vmem>>, %arg3: memref<128x64xbf16, #tpu.memory_space<vmem>>, %arg4: memref<64x2xbf16, #tpu.memory_space<vmem>>, %arg5: memref<8x128xf32, #tpu.memory_space<vmem>>, %arg6: memref<16x2xf32, #tpu.memory_space<vmem>>, %arg7: memref<16x128xf32, #tpu.memory_space<vmem>>) attributes {dimension_semantics = [#tpu.dimension_semantics<arbitrary>], iteration_bounds = array<i64: 2>, scalar_prefetch = 0 : i64, scratch_operands = 1 : i64, tpu.core_type = #tpu.core_type<tc>, window_params = [{transform_indices = @transform_0, window_bounds = array<i64: 8, 1152>}, {pipeline_mode = #tpu.pipeline_mode<synchronous>, transform_indices = @transform_1, window_bounds = array<i64: 1152, 128>}, {pipeline_mode = #tpu.pipeline_mode<synchronous>, transform_indices = @transform_2, window_bounds = array<i64: 128, 64>}, {pipeline_mode = #tpu.pipeline_mode<synchronous>, transform_indices = @transform_3, window_bounds = array<i64: 64, 2>}, {pipeline_mode = #tpu.pipeline_mode<synchronous>, transform_indices = @transform_4, window_bounds = array<i64: 8, 128>}, {pipeline_mode = #tpu.pipeline_mode<synchronous>, transform_indices = @transform_5, window_bounds = array<i64: 16, 2>}]} {
    %c8_i32 = arith.constant 8 : i32
    %0 = arith.muli %arg0, %c8_i32 : i32
    %1 = tpu.assume_multiple %0, 8 : i32
    %c0 = arith.constant 0 : index
    %c0_0 = arith.constant 0 : index
    %2 = vector.load %arg1[%c0, %c0_0] : memref<8x1152xbf16, #tpu.memory_space<vmem>>, vector<8x1152xbf16>
    %c0_1 = arith.constant 0 : index
    %c0_2 = arith.constant 0 : index
    %3 = vector.load %arg2[%c0_1, %c0_2] : memref<1152x128xbf16, #tpu.memory_space<vmem>>, vector<1152x128xbf16>
    %cst = arith.constant dense<0.000000e+00> : vector<8x128xf32>
    %4 = tpu.matmul %2, %3, %cst {dimension_numbers = #tpu.dot_dimension_numbers<[1], [0], [0], [1], [0, 0, 1, 1], [], []>} : vector<8x1152xbf16>, vector<1152x128xbf16>, vector<8x128xf32> -> vector<8x128xf32>
    %5 = arith.index_cast %1 : i32 to index
    %c0_3 = arith.constant 0 : index
    %6 = vector.load %arg7[%5, %c0_3] : memref<16x128xf32, #tpu.memory_space<vmem>>, vector<8x128xf32>
    tpu.vector_store %arg7[%5, %c0_3], %4 {strides = array<i32>} : memref<16x128xf32, #tpu.memory_space<vmem>>, vector<8x128xf32>,
    %c1_i32 = arith.constant 1 : i32
    %7 = arith.cmpi eq, %arg0, %c1_i32 : i32
    %8 = arith.extui %7 : i1 to i32
    %c0_i32 = arith.constant 0 : i32
    %9 = arith.cmpi ne, %8, %c0_i32 : i32
    scf.if %9 {
      %c0_4 = arith.constant 0 : index
      %c0_5 = arith.constant 0 : index
      %10 = vector.load %arg5[%c0_4, %c0_5] : memref<8x128xf32, #tpu.memory_space<vmem>>, vector<8x128xf32>
      %c0_6 = arith.constant 0 : index
      %c0_7 = arith.constant 0 : index
      %11 = vector.load %arg7[%c0_6, %c0_7] : memref<16x128xf32, #tpu.memory_space<vmem>>, vector<16x128xf32>
      %12 = tpu.iota {dimensions = array<i32: 0>} : vector<16x1xi32>
      %c16_i32 = arith.constant 16 : i32
      %13 = vector.broadcast %c16_i32 : i32 to vector<16x1xi32>
      %14 = arith.cmpi slt, %12, %13 : vector<16x1xi32>
      %cst_8 = arith.constant 0.000000e+00 : f32
      %15 = vector.shape_cast %14 : vector<16x1xi1> to vector<16x1xi1>
      %16 = vector.broadcast %15 : vector<16x1xi1> to vector<16x128xi1>
      %17 = vector.broadcast %cst_8 : f32 to vector<16x128xf32>
      %18 = arith.select %16, %11, %17 : vector<16x128xi1>, vector<16x128xf32>
      %cst_9 = arith.constant dense<0.000000e+00> : vector<128xf32>
      %19 = vector.multi_reduction <add>, %18, %cst_9 [0] : vector<16x128xf32> to vector<128xf32>
      %20 = vector.shape_cast %19 : vector<128xf32> to vector<1x128xf32>
      %cst_10 = arith.constant 6.250000e-02 : f32
      %21 = vector.broadcast %cst_10 : f32 to vector<1x128xf32>
      %22 = arith.mulf %20, %21 : vector<1x128xf32>
      %23 = vector.broadcast %22 : vector<1x128xf32> to vector<16x128xf32>
      %24 = arith.subf %11, %23 : vector<16x128xf32>
      %cst_11 = arith.constant 0.000000e+00 : f32
      %25 = vector.shape_cast %14 : vector<16x1xi1> to vector<16x1xi1>
      %26 = vector.broadcast %25 : vector<16x1xi1> to vector<16x128xi1>
      %27 = vector.broadcast %cst_11 : f32 to vector<16x128xf32>
      %28 = arith.select %26, %24, %27 : vector<16x128xi1>, vector<16x128xf32>
      %29 = arith.mulf %28, %28 : vector<16x128xf32>
      %cst_12 = arith.constant dense<0.000000e+00> : vector<128xf32>
      %30 = vector.multi_reduction <add>, %29, %cst_12 [0] : vector<16x128xf32> to vector<128xf32>
      %31 = vector.shape_cast %30 : vector<128xf32> to vector<1x128xf32>
      %cst_13 = arith.constant 6.250000e-02 : f32
      %32 = vector.broadcast %cst_13 : f32 to vector<1x128xf32>
      %33 = arith.mulf %31, %32 : vector<1x128xf32>
      %34 = vector.extract_strided_slice %10 {offsets = [0, 0], sizes = [1, 128], strides = [1, 1]} : vector<8x128xf32> to vector<1x128xf32>
      %cst_14 = arith.constant 9.99999974E-6 : f32
      %35 = vector.broadcast %cst_14 : f32 to vector<1x128xf32>
      %36 = arith.addf %33, %35 : vector<1x128xf32>
      %37 = math.rsqrt %36 : vector<1x128xf32>
      %38 = arith.mulf %34, %37 : vector<1x128xf32>
      %39 = vector.extract_strided_slice %10 {offsets = [1, 0], sizes = [1, 128], strides = [1, 1]} : vector<8x128xf32> to vector<1x128xf32>
      %40 = arith.mulf %22, %38 : vector<1x128xf32>
      %41 = arith.subf %39, %40 : vector<1x128xf32>
      %42 = vector.broadcast %38 : vector<1x128xf32> to vector<16x128xf32>
      %43 = arith.mulf %11, %42 : vector<16x128xf32>
      %44 = vector.broadcast %41 : vector<1x128xf32> to vector<16x128xf32>
      %45 = arith.addf %43, %44 : vector<16x128xf32>
      %cst_15 = arith.constant 0.000000e+00 : f32
      %46 = vector.broadcast %cst_15 : f32 to vector<16x128xf32>
      %47 = arith.maximumf %45, %46 : vector<16x128xf32>
      %48 = arith.truncf %47 : vector<16x128xf32> to vector<16x128xbf16>
      %c0_16 = arith.constant 0 : index
      %c0_17 = arith.constant 0 : index
      %49 = vector.load %arg3[%c0_16, %c0_17] : memref<128x64xbf16, #tpu.memory_space<vmem>>, vector<128x64xbf16>
      %cst_18 = arith.constant dense<0.000000e+00> : vector<16x64xf32>
      %50 = tpu.matmul %48, %49, %cst_18 {dimension_numbers = #tpu.dot_dimension_numbers<[1], [0], [0], [1], [0, 0, 1, 1], [], []>} : vector<16x128xbf16>, vector<128x64xbf16>, vector<16x64xf32> -> vector<16x64xf32>
      %cst_19 = arith.constant 0.000000e+00 : f32
      %51 = vector.shape_cast %14 : vector<16x1xi1> to vector<16x1xi1>
      %52 = vector.broadcast %51 : vector<16x1xi1> to vector<16x64xi1>
      %53 = vector.broadcast %cst_19 : f32 to vector<16x64xf32>
      %54 = arith.select %52, %50, %53 : vector<16x64xi1>, vector<16x64xf32>
      %cst_20 = arith.constant dense<0.000000e+00> : vector<64xf32>
      %55 = vector.multi_reduction <add>, %54, %cst_20 [0] : vector<16x64xf32> to vector<64xf32>
      %56 = vector.shape_cast %55 : vector<64xf32> to vector<1x64xf32>
      %cst_21 = arith.constant 6.250000e-02 : f32
      %57 = vector.broadcast %cst_21 : f32 to vector<1x64xf32>
      %58 = arith.mulf %56, %57 : vector<1x64xf32>
      %59 = vector.broadcast %58 : vector<1x64xf32> to vector<16x64xf32>
      %60 = arith.subf %50, %59 : vector<16x64xf32>
      %cst_22 = arith.constant 0.000000e+00 : f32
      %61 = vector.shape_cast %14 : vector<16x1xi1> to vector<16x1xi1>
      %62 = vector.broadcast %61 : vector<16x1xi1> to vector<16x64xi1>
      %63 = vector.broadcast %cst_22 : f32 to vector<16x64xf32>
      %64 = arith.select %62, %60, %63 : vector<16x64xi1>, vector<16x64xf32>
      %65 = arith.mulf %64, %64 : vector<16x64xf32>
      %cst_23 = arith.constant dense<0.000000e+00> : vector<64xf32>
      %66 = vector.multi_reduction <add>, %65, %cst_23 [0] : vector<16x64xf32> to vector<64xf32>
      %67 = vector.shape_cast %66 : vector<64xf32> to vector<1x64xf32>
      %cst_24 = arith.constant 6.250000e-02 : f32
      %68 = vector.broadcast %cst_24 : f32 to vector<1x64xf32>
      %69 = arith.mulf %67, %68 : vector<1x64xf32>
      %70 = vector.extract_strided_slice %10 {offsets = [2, 0], sizes = [1, 64], strides = [1, 1]} : vector<8x128xf32> to vector<1x64xf32>
      %cst_25 = arith.constant 9.99999974E-6 : f32
      %71 = vector.broadcast %cst_25 : f32 to vector<1x64xf32>
      %72 = arith.addf %69, %71 : vector<1x64xf32>
      %73 = math.rsqrt %72 : vector<1x64xf32>
      %74 = arith.mulf %70, %73 : vector<1x64xf32>
      %75 = vector.extract_strided_slice %10 {offsets = [3, 0], sizes = [1, 64], strides = [1, 1]} : vector<8x128xf32> to vector<1x64xf32>
      %76 = arith.mulf %58, %74 : vector<1x64xf32>
      %77 = arith.subf %75, %76 : vector<1x64xf32>
      %78 = vector.broadcast %74 : vector<1x64xf32> to vector<16x64xf32>
      %79 = arith.mulf %50, %78 : vector<16x64xf32>
      %80 = vector.broadcast %77 : vector<1x64xf32> to vector<16x64xf32>
      %81 = arith.addf %79, %80 : vector<16x64xf32>
      %cst_26 = arith.constant 0.000000e+00 : f32
      %82 = vector.broadcast %cst_26 : f32 to vector<16x64xf32>
      %83 = arith.maximumf %81, %82 : vector<16x64xf32>
      %84 = arith.truncf %83 : vector<16x64xf32> to vector<16x64xbf16>
      %c0_27 = arith.constant 0 : index
      %c0_28 = arith.constant 0 : index
      %85 = vector.load %arg4[%c0_27, %c0_28] : memref<64x2xbf16, #tpu.memory_space<vmem>>, vector<64x2xbf16>
      %cst_29 = arith.constant dense<0.000000e+00> : vector<16x2xf32>
      %86 = tpu.matmul %84, %85, %cst_29 {dimension_numbers = #tpu.dot_dimension_numbers<[1], [0], [0], [1], [0, 0, 1, 1], [], []>} : vector<16x64xbf16>, vector<64x2xbf16>, vector<16x2xf32> -> vector<16x2xf32>
      %87 = vector.extract_strided_slice %10 {offsets = [4, 0], sizes = [1, 2], strides = [1, 1]} : vector<8x128xf32> to vector<1x2xf32>
      %88 = vector.broadcast %87 : vector<1x2xf32> to vector<16x2xf32>
      %89 = arith.addf %86, %88 : vector<16x2xf32>
      %c0_30 = arith.constant 0 : index
      %c0_31 = arith.constant 0 : index
      %90 = vector.load %arg6[%c0_30, %c0_31] : memref<16x2xf32, #tpu.memory_space<vmem>>, vector<16x2xf32>
      tpu.vector_store %arg6[%c0_30, %c0_31], %89 {strides = array<i32>} : memref<16x2xf32, #tpu.memory_space<vmem>>, vector<16x2xf32>,
    } else {
    }
    return
  }
  func.func @transform_0(%arg0: i32) -> (i32, i32) {
    %c0_i32 = arith.constant 0 : i32
    %c0_i32_0 = arith.constant 0 : i32
    return %arg0, %c0_i32 : i32, i32
  }
  func.func @transform_1(%arg0: i32) -> (i32, i32) {
    %c0_i32 = arith.constant 0 : i32
    %c0_i32_0 = arith.constant 0 : i32
    %c0_i32_1 = arith.constant 0 : i32
    return %c0_i32, %c0_i32_0 : i32, i32
  }
  func.func @transform_2(%arg0: i32) -> (i32, i32) {
    %c0_i32 = arith.constant 0 : i32
    %c0_i32_0 = arith.constant 0 : i32
    %c0_i32_1 = arith.constant 0 : i32
    return %c0_i32, %c0_i32_0 : i32, i32
  }
  func.func @transform_3(%arg0: i32) -> (i32, i32) {
    %c0_i32 = arith.constant 0 : i32
    %c0_i32_0 = arith.constant 0 : i32
    %c0_i32_1 = arith.constant 0 : i32
    return %c0_i32, %c0_i32_0 : i32, i32
  }
  func.func @transform_4(%arg0: i32) -> (i32, i32) {
    %c0_i32 = arith.constant 0 : i32
    %c0_i32_0 = arith.constant 0 : i32
    %c0_i32_1 = arith.constant 0 : i32
    return %c0_i32, %c0_i32_0 : i32, i32
  }
  func.func @transform_5(%arg0: i32) -> (i32, i32) {
    %c0_i32 = arith.constant 0 : i32
    %c0_i32_0 = arith.constant 0 : i32
    %c0_i32_1 = arith.constant 0 : i32
    return %c0_i32, %c0_i32_0 : i32, i32
  }
}

</mosaic_0001>

<bundles_post_ra>
// kernel: tpu_custom_call.1
= control target key start
LH: loop header
LB: loop body
LE: loop exit
PB: predicated region body
PF: predicated region fallthrough
CT: control target
= control target key end

     0   :  { %10 = vsyncpa [#allocation4], 0  ;;  %s1855_s18 = smov 0   ;;  %s1995_s0 = inlined_call_operand.vmem [shape: bf16[16,1152], index: 0, kind: input, shape index: {}]   ;;  %s1996_s1 = inlined_call_operand.hbm [shape: bf16[1152,128], index: 1, kind: input, shape index: {}]   ;;  %s1997_s2 = inlined_call_operand.vmem [shape: bf16[128,64], index: 2, kind: input, shape index: {}]   ;;  %s1998_s3 = inlined_call_operand.vmem [shape: bf16[64,2], index: 3, kind: input, shape index: {}]   ;;  %s1999_s4 = inlined_call_operand.vmem [shape: f32[8,128], index: 4, kind: input, shape index: {}]   ;;  %s2000_s5 = inlined_call_operand.vmem [shape: f32[16,2], index: 5, kind: output, shape index: {}]  }
   0x1 LB: > { %s1861_s19 = sadd.s32 4294967295, %s1816_s18   ;;  %p1388_p0 = scmp.ge.s32.totalorder %s1816_s18, 1  ;;  %s1816_s18 = sphi %s1855_s18, %s16_s18  }
   0x2   : > { %p152_p1 = scmp.lt.s32.totalorder %s1816_s18, 3  ;;  %s1818_s20 = smov [#allocation3]  }
   0x3   : > { %s164_s21 = sshll.u32 %s1818_s20, 4  ;;  %p2001_p3 = scmp.eq.s32.totalorder %s1861_s19, 0  ;;  %s165_s21 = int_to_ptr.vmem [resolvable:$true] %s164_s21 }
   0x4   : > { %p1865_p2 = pnand %p1388_p0, %p152_p1  ;;  %s1778_s26 = scalar_lea.hbm %s1996_s1, 9216 }
   0x5   : > { %p1779_p6 = scmp.ne.s32.totalorder %s1996_s1, %s1778_s26  ;;  %p1785_p10 = scmp.lt.u32.totalorder %s1778_s26, %s1996_s1 }
   0x6   : > { %s2003_s22 = scalar_select %p1865_p2, 1, 0 }
   0x7   : > { %p1660_p4 = pneg %p1865_p2 }
   0x9   : > { %p1874_p5 = pnand %p2001_p3, %p1660_p4 }
   0xb   : > { %p1780_p7 = pneg %p1874_p5 }
   0xd   : > { %p1781_p8 = pnand %p1780_p7, %p1779_p6 }
   0xf   : > { %p1782_p9 = pneg %p1781_p8 }
  0x11   : > { %p1787_p11 = pnand %p1785_p10, %p1782_p9 }
  0x13   : > { %1790 = shalt.err (!%p1787_p11)
}
  0x14   : > { %s1791_s6 = scalar_lea.vmem %s165_s21, 9216  ;;  %p1799_p1 = scmp.lt.s32.totalorder %s165_s21, %s165_s21 }
  0x15   : > { %p1792_p12 = scmp.ne.s32.totalorder %s165_s21, %s1791_s6  ;;  %p1800_p4 = scmp.lt.s32.totalorder %s1791_s6, %s1791_s6 }
  0x17   : > { %p1794_p13 = pnand %p1792_p12, %p1780_p7  ;;  %p1801_p3 = por %p1800_p4, %p1799_p1 }
  0x19   : > { %p1795_p0 = pneg %p1794_p13 }
  0x1b   : > { %p1802_p2 = pnand %p1801_p3, %p1795_p0 }
  0x1d   : > { %1805 = shalt.err (!%p1802_p2)
}
  0x1e   : > { %s1819_s7 = smov 64   ;;  %s1820_s8 = smov 4  }
  0x1f   : > { %1663 = dma.hbm_to_vmem [thread:$0]  (!%p1874_p5), %s1996_s1, 9216, %s165_s21, [#allocation4], %s1819_s7, %s1819_s7, %s1820_s8  }
  0x20   : > { %p2005_p6 = scmp.ne.s32.totalorder %s2003_s22, 0 }
  0x21   : > { %p2006_p8 = scmp.eq.s32.totalorder (!%p2005_p6), %s1861_s19, 0 }
  0x22   : > { %197 = sbr.rel (%p2005_p6) target bundleno = 925 (0x39d), region = 40 }
  0x29   : > { %1811 = dma.done.wait (%p2006_p8), [#allocation4], 9216   ;;  %p2007_p7 = pmov %p2006_p8 }
  0x2a   : > { %v1681_v0 = vld [vmem:[#allocation3 + $0x40] sm:$0xff]   ;;  %v1685_v4 = vld [vmem:[#allocation3 + $0x48] sm:$0xff]   ;;  %v1689_v8 = vld [vmem:[#allocation3 + $0x50] sm:$0xff]   ;;  %p220_p2 = scmp.lt.s32.totalorder %s1861_s19, 1  ;;  %vm1822_vm0 = vmmov 0   ;;  %s1394_s16 = sshll.u32 %s1861_s19, 3 }
  0x2b   : > { %1813 = vsyncadd (%p2007_p7), [#allocation4], 4294958080  ;;  %v1682_v1 = vld [vmem:[#allocation3 + $0xc0] sm:$0xff]   ;;  %1492 = vmatprep.subr.bf16.mxu0 %v1681_v0  ;;  %v1686_v5 = vld [vmem:[#allocation3 + $0xc8] sm:$0xff]   ;;  %s1040_s17 = scalar_lea.vmem [#allocation2], %s1394_s16  ;;  %p1476_p3 = scmp.ne.s32.totalorder %s1861_s19, 1 }
  0x2c   : > { %v1683_v2 = vld [vmem:[#allocation3] sm:$0xff]   ;;  %1514 = vmatprep.subr.bf16.mxu1 %v1682_v1  ;;  %v1687_v6 = vld [vmem:[#allocation3 + $0x8] sm:$0xff]   ;;  %v1690_v9 = vld [vmem:[#allocation3 + $0xd0] sm:$0xff]   ;;  %s221_s11 = scalar_select %p220_p2, %s1861_s19, 1 }
  0x2d   : > { %v1684_v3 = vld [vmem:[#allocation3 + $0x80] sm:$0xff]   ;;  %1493 = vmatpush3.bf16.msra.mxu0 %v1683_v2  ;;  %v1688_v7 = vld [vmem:[#allocation3 + $0x88] sm:$0xff]   ;;  %v1691_v10 = vld [vmem:[#allocation3 + $0x10] sm:$0xff]   ;;  %vm1824_vm1 = vmmov (!%p1476_p3), 0   ;;  %vm1212_vm2 = vcmask (!%p1476_p3), 523264   ;;  %vm1342_vm3 = vcmask (!%p1476_p3), 15360  }
  0x2e   : > { %1515 = vmatpush3.bf16.msra.mxu1 %v1684_v3  ;;  %1494 = vmatprep.subr.bf16.mxu0 %v1685_v4  ;;  %v1692_v11 = vld [vmem:[#allocation3 + $0x90] sm:$0xff]   ;;  %v1693_v12 = vld [vmem:[#allocation3 + $0x58] sm:$0xff]   ;;  %v1697_v16 = vld [vmem:[#allocation3 + $0x60] sm:$0xff]   ;;  %s1655_s12 = smul.u32 36, %s221_s11 }
  0x2f   : > { %1516 = vmatprep.subr.bf16.mxu1 %v1686_v5  ;;  %v1694_v13 = vld [vmem:[#allocation3 + $0xd8] sm:$0xff]   ;;  %v1698_v17 = vld [vmem:[#allocation3 + $0xe0] sm:$0xff]   ;;  %v1701_v20 = vld [vmem:[#allocation3 + $0x68] sm:$0xff]  }
  0x30   : > { %v1695_v14 = vld [vmem:[#allocation3 + $0x18] sm:$0xff]   ;;  %v1699_v18 = vld [vmem:[#allocation3 + $0x20] sm:$0xff]   ;;  %v1702_v21 = vld [vmem:[#allocation3 + $0xe8] sm:$0xff]   ;;  %s1905_s15 = scalar_lea.vmem %s1995_s0, %s1655_s12 }
  0x31   : > { %1495 = vmatpush3.bf16.msra.mxu0 %v1687_v6  ;;  %v1696_v15 = vld [vmem:[#allocation3 + $0x98] sm:$0xff]   ;;  %v1700_v19 = vld [vmem:[#allocation3 + $0xa0] sm:$0xff]   ;;  %v1703_v22 = vld [vmem:[#allocation3 + $0x28] sm:$0xff]  }
  0x32   : > { %1517 = vmatpush3.bf16.msra.mxu1 %v1688_v7  ;;  %1496 = vmatprep.subr.bf16.mxu0 %v1689_v8  ;;  %v1704_v23 = vld [vmem:[#allocation3 + $0xa8] sm:$0xff]   ;;  %v1705_v24 = vld [vmem:[#allocation3 + $0x70] sm:$0xff]   ;;  %v1709_v28 = vld [vmem:[#allocation3 + $0x78] sm:$0xff]  }
  0x33   : > { %1518 = vmatprep.subr.bf16.mxu1 %v1690_v9  ;;  %v1706_v25 = vld [vmem:[#allocation3 + $0xf0] sm:$0xff]   ;;  %v1710_v29 = vld [vmem:[#allocation3 + $0xf8] sm:$0xff]   ;;  %v1717_v38 = vld [vmem:[#allocation3 + $0x140] sm:$0xff]  }
  0x34   : > { %v1707_v26 = vld [vmem:[#allocation3 + $0x30] sm:$0xff]   ;;  %v1711_v30 = vld [vmem:[#allocation3 + $0x38] sm:$0xff]   ;;  %v1718_v39 = vld [vmem:[#allocation3 + $0x100] sm:$0xff]  }
  0x35   : > { %1497 = vmatpush3.bf16.msra.mxu0 %v1691_v10  ;;  %v1708_v27 = vld [vmem:[#allocation3 + $0xb0] sm:$0xff]   ;;  %v1712_v31 = vld [vmem:[#allocation3 + $0xb8] sm:$0xff]   ;;  %v1719_v40 = vld [vmem:[#allocation3 + $0x1c0] sm:$0xff]  }
  0x36   : > { %1519 = vmatpush3.bf16.msra.mxu1 %v1692_v11  ;;  %1498 = vmatprep.subr.bf16.mxu0 %v1693_v12  ;;  %v227_v32 = vld [vmem:[%s1905_s15] sm:$0xff]  ;;  %v228_v33 = vld [vmem:[%s1905_s15 + $0x8] sm:$0xff]  ;;  %v1720_v41 = vld [vmem:[#allocation3 + $0x180] sm:$0xff]  }
  0x37   : > { %1520 = vmatprep.subr.bf16.mxu1 %v1694_v13  ;;  %v1395_v34 = vcombine.low %v227_v32, %v227_v32  ;;  %v1396_v35 = vcombine.high %v227_v32, %v227_v32  ;;  %v1397_v36 = vcombine.low %v228_v33, %v228_v33  ;;  %v1398_v37 = vcombine.high %v228_v33, %v228_v33  ;;  %v1721_v42 = vld [vmem:[#allocation3 + $0x148] sm:$0xff]   ;;  %v1725_v46 = vld [vmem:[#allocation3 + $0x150] sm:$0xff]   ;;  %v1729_v50 = vld [vmem:[#allocation3 + $0x158] sm:$0xff]  }
  0x38   : > { %v1722_v43 = vld [vmem:[#allocation3 + $0x108] sm:$0xff]   ;;  %v1726_v47 = vld [vmem:[#allocation3 + $0x110] sm:$0xff]   ;;  %v1730_v51 = vld [vmem:[#allocation3 + $0x118] sm:$0xff]   ;;  %v1821_v13 = vmov 0.0  }
  0x39   : > { %1499 = vmatpush3.bf16.msra.mxu0 %v1695_v14  ;;  %872 = vmatprep.mubr.bf16.mxu0 %v1396_v35  ;;  %v1723_v44 = vld [vmem:[#allocation3 + $0x1c8] sm:$0xff]   ;;  %v1727_v48 = vld [vmem:[#allocation3 + $0x1d0] sm:$0xff]   ;;  %v1731_v52 = vld [vmem:[#allocation3 + $0x1d8] sm:$0xff]  }
  0x3a   : > { %1521 = vmatpush3.bf16.msra.mxu1 %v1696_v15  ;;  %1500 = vmatprep.subr.bf16.mxu0 %v1697_v16  ;;  %v1724_v45 = vld [vmem:[#allocation3 + $0x188] sm:$0xff]   ;;  %v1728_v49 = vld [vmem:[#allocation3 + $0x190] sm:$0xff]   ;;  %v1732_v53 = vld [vmem:[#allocation3 + $0x198] sm:$0xff]  }
  0x3b   : > { %1522 = vmatprep.subr.bf16.mxu1 %v1698_v17  ;;  %912 = vmatprep.mubr.bf16.mxu1 %v1398_v37  ;;  %v1733_v54 = vld [vmem:[#allocation3 + $0x160] sm:$0xff]   ;;  %v1737_v58 = vld [vmem:[#allocation3 + $0x168] sm:$0xff]   ;;  %v1741_v62 = vld [vmem:[#allocation3 + $0x170] sm:$0xff]  }
  0x3c   : > { %v1734_v55 = vld [vmem:[#allocation3 + $0x120] sm:$0xff]   ;;  %v1738_v59 = vld [vmem:[#allocation3 + $0x128] sm:$0xff]   ;;  %v1742_v63 = vld [vmem:[#allocation3 + $0x130] sm:$0xff]  }
  0x3d   : > { %1501 = vmatpush3.bf16.msra.mxu0 %v1699_v18  ;;  %v1735_v56 = vld [vmem:[#allocation3 + $0x1e0] sm:$0xff]   ;;  %v1739_v60 = vld [vmem:[#allocation3 + $0x1e8] sm:$0xff]   ;;  %v1743_v0 = vld [vmem:[#allocation3 + $0x1f0] sm:$0xff]  }
  0x3e   : > { %1523 = vmatpush3.bf16.msra.mxu1 %v1700_v19  ;;  %1502 = vmatprep.subr.bf16.mxu0 %v1701_v20  ;;  %v1736_v57 = vld [vmem:[#allocation3 + $0x1a0] sm:$0xff]   ;;  %v1740_v61 = vld [vmem:[#allocation3 + $0x1a8] sm:$0xff]   ;;  %v1744_v1 = vld [vmem:[#allocation3 + $0x1b0] sm:$0xff]  }
  0x3f   : > { %1524 = vmatprep.subr.bf16.mxu1 %v1702_v21  ;;  %v1745_v2 = vld [vmem:[#allocation3 + $0x178] sm:$0xff]   ;;  %v229_v5 = vld [vmem:[%s1905_s15 + $0x10] sm:$0xff]  ;;  %v230_v9 = vld [vmem:[%s1905_s15 + $0x18] sm:$0xff] }
  0x40   : > { %v1746_v3 = vld [vmem:[#allocation3 + $0x138] sm:$0xff]   ;;  %v1400_v6 = vcombine.high %v229_v5, %v229_v5  ;;  %v1399_v8 = vcombine.low %v229_v5, %v229_v5  ;;  %v1401_v10 = vcombine.low %v230_v9, %v230_v9  ;;  %v1402_v11 = vcombine.high %v230_v9, %v230_v9  ;;  %v1753_v12 = vld [vmem:[#allocation3 + $0x200] sm:$0xff]   ;;  %v1754_v14 = vld [vmem:[#allocation3 + $0x208] sm:$0xff]  }
  0x41   : > { %1503 = vmatpush3.bf16.msra.mxu0 %v1703_v22  ;;  %v1747_v4 = vld [vmem:[#allocation3 + $0x1f8] sm:$0xff]   ;;  %v1755_v15 = vld [vmem:[#allocation3 + $0x210] sm:$0xff]   ;;  %v1757_v17 = vld [vmem:[#allocation3 + $0x220] sm:$0xff]  }
  0x42   : > { %1525 = vmatpush3.bf16.msra.mxu1 %v1704_v23  ;;  %1504 = vmatprep.subr.bf16.mxu0 %v1705_v24  ;;  %v1750_v7 = vld [vmem:[#allocation3 + $0x1b8] sm:$0xff]   ;;  %v1758_v18 = vld [vmem:[#allocation3 + $0x228] sm:$0xff]   ;;  %v1759_v19 = vld [vmem:[#allocation3 + $0x230] sm:$0xff]  }
  0x43   : > { %1526 = vmatprep.subr.bf16.mxu1 %v1706_v25  ;;  %v1756_v16 = vld [vmem:[#allocation3 + $0x218] sm:$0xff]   ;;  %v1761_v21 = vld [vmem:[%s1905_s15 + $0x20] ss:$0 sps:$4 sm:$0xff]  }
  0x44   : > { %v1760_v20 = vld [vmem:[#allocation3 + $0x238] sm:$0xff]  }
  0x45   : > { %1505 = vmatpush3.bf16.msra.mxu0 %v1707_v26 }
  0x46   : > { %1527 = vmatpush3.bf16.msra.mxu1 %v1708_v27  ;;  %1506 = vmatprep.subr.bf16.mxu0 %v1709_v28 }
  0x47   : > { %1528 = vmatprep.subr.bf16.mxu1 %v1710_v29 }
  0x49   : > { %1507 = vmatpush3.bf16.msra.mxu0 %v1711_v30 }
  0x4a   : > { %1529 = vmatpush3.bf16.msra.mxu1 %v1712_v31  ;;  %1536 = vmatprep.subr.bf16.mxu0 %v1717_v38 }
  0x4b   : > { %1558 = vmatprep.subr.bf16.mxu1 %v1719_v40 }
  0x4c   : > { %873 = vmatmul.mubr.bf16.vlgmr.msra.gmra.mrb[0].mxu0 %v1395_v34 }
  0x4d   : > { %913 = vmatmul.mubr.bf16.vlgmr.msra.gmra.mrb[0].mxu1 %v1397_v36  ;;  %1537 = vmatpush3.bf16.msra.mxu0 %v1718_v39 }
  0x4e   : > { %1559 = vmatpush3.bf16.msra.mxu1 %v1720_v41  ;;  %1538 = vmatprep.subr.bf16.mxu0 %v1721_v42 }
  0x4f   : > { %1560 = vmatprep.subr.bf16.mxu1 %v1723_v44  ;;  %952 = vmatprep.mubr.bf16.mxu0 %v1400_v6  ;;  %v1769_v6 = vld [vmem:[%s1997_s2 + $0x38] sm:$0xff] (!%p1476_p3)  }
  0x50   : > { %992 = vmatprep.mubr.bf16.mxu1 %v1402_v11 }
  0x51   : > { %1539 = vmatpush3.bf16.msra.mxu0 %v1722_v43 }
  0x52   : > { %1561 = vmatpush3.bf16.msra.mxu1 %v1724_v45  ;;  %1540 = vmatprep.subr.bf16.mxu0 %v1725_v46 }
  0x53   : > { %1562 = vmatprep.subr.bf16.mxu1 %v1727_v48 }
  0x55   : > { %1541 = vmatpush3.bf16.msra.mxu0 %v1726_v47 }
  0x56   : > { %1563 = vmatpush3.bf16.msra.mxu1 %v1728_v49  ;;  %1542 = vmatprep.subr.bf16.mxu0 %v1729_v50  ;;  %v1762_v50 = vld [vmem:[%s1997_s2] sm:$0xff] (!%p1476_p3)  }
  0x57   : > { %1564 = vmatprep.subr.bf16.mxu1 %v1731_v52  ;;  %v1763_v52 = vld [vmem:[%s1997_s2 + $0x8] sm:$0xff] (!%p1476_p3)  }
  0x59   : > { %1543 = vmatpush3.bf16.msra.mxu0 %v1730_v51  ;;  %v1823_v51 = vmov (!%p1476_p3), 0.0  }
  0x5a   : > { %1565 = vmatpush3.bf16.msra.mxu1 %v1732_v53  ;;  %1544 = vmatprep.subr.bf16.mxu0 %v1733_v54  ;;  %v1764_v53 = vld [vmem:[%s1997_s2 + $0x10] sm:$0xff] (!%p1476_p3)   ;;  %v1765_v54 = vld [vmem:[%s1997_s2 + $0x18] sm:$0xff] (!%p1476_p3)  }
  0x5b   : > { %1566 = vmatprep.subr.bf16.mxu1 %v1735_v56 }
  0x5d   : > { %1545 = vmatpush3.bf16.msra.mxu0 %v1734_v55 }
  0x5e   : > { %1567 = vmatpush3.bf16.msra.mxu1 %v1736_v57  ;;  %1546 = vmatprep.subr.bf16.mxu0 %v1737_v58 }
  0x5f   : > { %1568 = vmatprep.subr.bf16.mxu1 %v1739_v60  ;;  %v1766_v60 = vld [vmem:[%s1997_s2 + $0x20] sm:$0xff] (!%p1476_p3)  }
  0x61   : > { %1547 = vmatpush3.bf16.msra.mxu0 %v1738_v59 }
  0x62   : > { %1569 = vmatpush3.bf16.msra.mxu1 %v1740_v61  ;;  %1548 = vmatprep.subr.bf16.mxu0 %v1741_v62 }
  0x63   : > { %1570 = vmatprep.subr.bf16.mxu1 %v1743_v0 }
  0x65   : > { %1549 = vmatpush3.bf16.msra.mxu0 %v1742_v63  ;;  %v1767_v63 = vld [vmem:[%s1997_s2 + $0x28] sm:$0xff] (!%p1476_p3)  }
  0x66   : > { %1571 = vmatpush3.bf16.msra.mxu1 %v1744_v1  ;;  %1550 = vmatprep.subr.bf16.mxu0 %v1745_v2  ;;  %v1768_v2 = vld [vmem:[%s1997_s2 + $0x30] sm:$0xff] (!%p1476_p3)  }
  0x67   : > { %1572 = vmatprep.subr.bf16.mxu1 %v1747_v4 }
  0x69   : > { %1551 = vmatpush3.bf16.msra.mxu0 %v1746_v3 }
  0x6a   : > { %1573 = vmatpush3.bf16.msra.mxu1 %v1750_v7  ;;  %1603 = vmatprep.subr.bf16.mxu0 %v1821_v13 }
  0x6b   : > { %1643 = vmatprep.subr.bf16.mxu1 (!%p1476_p3), %v1823_v51 }
  0x6c   : > { %953 = vmatmul.mubr.bf16.vlgmr.msra.gmra.mrb[4].mxu0 %v1399_v8 }
  0x6d   : > { %1604 = vmatpush3.bf16.msra.mxu0 %v1753_v12  ;;  %993 = vmatmul.mubr.bf16.vlgmr.msra.gmra.mrb[4].mxu1 %v1401_v10 }
  0x6e   : > { %1605 = vmatprep.subr.bf16.mxu0 %v1821_v13  ;;  %1619 = vmatprep.mubr.msk.bf16.mxu0 %vm1822_vm0, %v1821_v13 }
  0x6f   : > { %1651 = vmatprep.mubr.msk.bf16.mxu1 (!%p1476_p3), %vm1824_vm1, %v1823_v51 }
  0x71   : > { %1606 = vmatpush3.bf16.msra.mxu0 %v1754_v14 }
  0x72   : > { %1607 = vmatprep.subr.bf16.mxu0 %v1821_v13 }
  0x75   : > { %1608 = vmatpush3.bf16.msra.mxu0 %v1755_v15 }
  0x76   : > { %1609 = vmatprep.subr.bf16.mxu0 %v1821_v13 }
  0x79   : > { %1610 = vmatpush3.bf16.msra.mxu0 %v1756_v16 }
  0x7a   : > { %1611 = vmatprep.subr.bf16.mxu0 %v1821_v13 }
  0x7d   : > { %1612 = vmatpush3.bf16.msra.mxu0 %v1757_v17 }
  0x7e   : > { %1613 = vmatprep.subr.bf16.mxu0 %v1821_v13 }
  0x81   : > { %1614 = vmatpush3.bf16.msra.mxu0 %v1758_v18  ;;  %v1090_v18 = vlaneseq (!%p1476_p3) }
  0x82   : > { %1615 = vmatprep.subr.bf16.mxu0 %v1821_v13 }
  0x85   : > { %1616 = vmatpush3.bf16.msra.mxu0 %v1759_v19  ;;  %v1949_v19 = vshrl.u32 (!%p1476_p3), %v1090_v18, 7 }
  0x86   : > { %1617 = vmatprep.subr.bf16.mxu0 %v1821_v13 }
  0x89   : > { %1618 = vmatpush3.bf16.msra.mxu0 %v1760_v20  ;;  %v1954_v20 = vld [vmem:[%s1999_s4] sm:$0xff] (!%p1476_p3) }
  0x8a   : > { %1623 = vmatprep.subr.bf16.mxu0 (!%p1476_p3), %v1823_v51 }
  0x8c   : > { %1620 = vmatmul.mubr.bf16.vlgmr.msra.gmra.mrb[8].mxu0 %v1761_v21  ;;  %v1092_v21 = vsub.s32 (!%p1476_p3), 0, %v1949_v19 }
  0x8d   : > { %1624 = vmatpush3.bf16.msra.mxu0 (!%p1476_p3), %v1762_v50  ;;  %1639 = vmatprep.mubr.msk.bf16.mxu0 (!%p1476_p3), %vm1824_vm1, %v1823_v51 }
  0x8e   : > { %1625 = vmatprep.subr.bf16.mxu0 (!%p1476_p3), %v1823_v51 }
  0x91   : > { %1626 = vmatpush3.bf16.msra.mxu0 (!%p1476_p3), %v1763_v52 }
  0x92   : > { %1627 = vmatprep.subr.bf16.mxu0 (!%p1476_p3), %v1823_v51 }
  0x95   : > { %1628 = vmatpush3.bf16.msra.mxu0 (!%p1476_p3), %v1764_v53 }
  0x96   : > { %1629 = vmatprep.subr.bf16.mxu0 (!%p1476_p3), %v1823_v51 }
  0x99   : > { %1630 = vmatpush3.bf16.msra.mxu0 (!%p1476_p3), %v1765_v54 }
  0x9a   : > { %1631 = vmatprep.subr.bf16.mxu0 (!%p1476_p3), %v1823_v51 }
  0x9d   : > { %1632 = vmatpush3.bf16.msra.mxu0 (!%p1476_p3), %v1766_v60 }
  0x9e   : > { %1633 = vmatprep.subr.bf16.mxu0 (!%p1476_p3), %v1823_v51 }
  0xa1   : > { %1634 = vmatpush3.bf16.msra.mxu0 (!%p1476_p3), %v1767_v63 }
  0xa2   : > { %1635 = vmatprep.subr.bf16.mxu0 (!%p1476_p3), %v1823_v51 }
  0xa5   : > { %1636 = vmatpush3.bf16.msra.mxu0 (!%p1476_p3), %v1768_v2 }
  0xa6   : > { %1637 = vmatprep.subr.bf16.mxu0 (!%p1476_p3), %v1823_v51 }
  0xa9   : > { %1638 = vmatpush3.bf16.msra.mxu0 (!%p1476_p3), %v1769_v6  ;;  %v1249_v6 = vsub.s32 (!%p1476_p3), 2, %v1949_v19 }
 0x11f   : > { %v1508_v22 = vpop.f32.mrb[0].mxu0 }
 0x120   : > { %v1530_v23 = vpop.f32.mrb[0].mxu1  ;;  %v1509_v24 = vpop.f32.mrb[1].mxu0 }
 0x121   : > { %v1531_v25 = vpop.f32.mrb[1].mxu1  ;;  %v1510_v26 = vadd.f32 %v1509_v24, %v1508_v22  ;;  %v1511_v28 = vpop.f32.mrb[2].mxu0 }
 0x122   : > { %v1532_v27 = vadd.f32 %v1531_v25, %v1530_v23  ;;  %v1533_v29 = vpop.f32.mrb[2].mxu1  ;;  %v1512_v30 = vpop.f32.mrb[3].mxu0 }
 0x123   : > { %v1534_v31 = vpop.f32.mrb[3].mxu1 }
 0x124   : > { %v915_v32 = vadd.f32 %v1532_v27, %v1510_v26  ;;  %v1098_v27 = vsub.s32 (!%p1476_p3), 1, %v1949_v19 }
 0x13f   : > { %v1552_v33 = vpop.f32.mrb[4].mxu0 }
 0x140   : > { %v1553_v34 = vpop.f32.mrb[5].mxu0  ;;  %v1574_v35 = vpop.f32.mrb[4].mxu1 }
 0x141   : > { %v1554_v36 = vadd.f32 %v1553_v34, %v1552_v33  ;;  %v1555_v37 = vpop.f32.mrb[6].mxu0  ;;  %v1575_v38 = vpop.f32.mrb[5].mxu1 }
 0x142   : > { %v1556_v39 = vpop.f32.mrb[7].mxu0  ;;  %v1576_v40 = vadd.f32 %v1575_v38, %v1574_v35  ;;  %v1577_v41 = vpop.f32.mrb[6].mxu1  ;;  %v1770_v37 = vld [vmem:[%s1998_s3] sm:$0xff] (!%p1476_p3)   ;;  %v1771_v38 = vld [vmem:[%s1998_s3 + $0x8] sm:$0xff] (!%p1476_p3)  }
 0x143   : > { %v955_v42 = vadd.f32 %v1554_v36, %v915_v32  ;;  %v1578_v43 = vpop.f32.mrb[7].mxu1  ;;  %1644 = vmatpush3.bf16.msra.mxu1 (!%p1476_p3), %v1770_v37  ;;  %v1772_v39 = vld [vmem:[%s1998_s3 + $0x10] sm:$0xff] (!%p1476_p3)  }
 0x144   : > { %1645 = vmatprep.subr.bf16.mxu1 (!%p1476_p3), %v1823_v51 }
 0x145   : > { %v995_v44 = vadd.f32 %v1576_v40, %v955_v42  ;;  %v1773_v40 = vld [vmem:[%s1998_s3 + $0x18] sm:$0xff] (!%p1476_p3)  }
 0x147   : > { %1646 = vmatpush3.bf16.msra.mxu1 (!%p1476_p3), %v1771_v38 }
 0x148   : > { %1647 = vmatprep.subr.bf16.mxu1 (!%p1476_p3), %v1823_v51 }
 0x14b   : > { %1648 = vmatpush3.bf16.msra.mxu1 (!%p1476_p3), %v1772_v39 }
 0x14c   : > { %1649 = vmatprep.subr.bf16.mxu1 (!%p1476_p3), %v1823_v51 }
 0x14f   : > { %1650 = vmatpush3.bf16.msra.mxu1 (!%p1476_p3), %v1773_v40 }
 0x15c   : > { %1045 = sbr.rel (%p1476_p3) target bundleno = 925 (0x39d), region = 48 }
 0x15f   : > { %v1034_v45 = vpop.f32.mrb[8].mxu0 }
 0x160   : > { %v1035_v46 = vadd.f32 %v1034_v45, %v995_v44  ;;  %v1621_v47 = vpop.f32.mrb[9].mxu0 }
 0x161   : > { %v1037_v48 = vpop.f32.mrb[10].mxu0 }
 0x162   : > { %1041 = vst [vmem:[%s1040_s17] sm:$0xff] %v1035_v46  ;;  %v1622_v49 = vpop.f32.mrb[11].mxu0 }
 0x169   : > { %v1047_v55 = vld [vmem:[#allocation2] sm:$0xff]  ;;  %v1048_v56 = vld [vmem:[#allocation2 + $0x8] sm:$0xff] }
 0x16a   : > { %v1060_v57 = vadd.f32 %v1048_v56, %v1047_v55 }
 0x16c   : > { %v1061_v58 = vrot.slane %v1060_v57, 4 }
 0x16e   : > { %v1062_v59 = vadd.f32 %v1061_v58, %v1060_v57 }
 0x170   : > { %v1063_v61 = vrot.slane %v1062_v59, 2 }
 0x172   : > { %v1064_v62 = vadd.f32 %v1063_v61, %v1062_v59 }
 0x174   : > { %v1065_v0 = vrot.slane %v1064_v62, 1 }
 0x176   : > { %v1066_v1 = vadd.f32 %v1065_v0, %v1064_v62 }
 0x178   : > { %v1067_v3 = vmul.f32 0.0625, %v1066_v1 }
 0x17a   : > { %v1068_v4 = vsub.f32 %v1047_v55, %v1067_v3  ;;  %v1069_v5 = vsub.f32 %v1048_v56, %v1067_v3 }
 0x17c   : > { %v1072_v7 = vmul.f32 %v1068_v4, %v1068_v4  ;;  %v1073_v8 = vmul.f32 %v1069_v5, %v1069_v5 }
 0x17e   : > { %v1074_v9 = vadd.f32 %v1073_v8, %v1072_v7 }
 0x180   : > { %v1075_v10 = vrot.slane %v1074_v9, 4 }
 0x182   : > { %v1076_v11 = vadd.f32 %v1075_v10, %v1074_v9 }
 0x184   : > { %v1077_v12 = vrot.slane %v1076_v11, 2 }
 0x186   : > { %v1078_v13 = vadd.f32 %v1077_v12, %v1076_v11 }
 0x188   : > { %v1079_v14 = vrot.slane %v1078_v13, 1 }
 0x18a   : > { %v1080_v15 = vadd.f32 %v1079_v14, %v1078_v13  ;;  %v1255_v14 = vsub.s32 3, %v1949_v19 }
 0x18c   : > { %v1081_v16 = vmul.f32 0.0625, %v1080_v15 }
 0x18e   : > { %v1082_v17 = vadd.f32 1e-05, %v1081_v16 }
 0x190   : > { %1774 = vrsqrt.f32 %v1082_v17 }
 0x19a   : > { %v1775_v22 = vpop.eup %1774 }
 0x19b   : > { %v1084_v23 = vmul.f32 %v1775_v22, %v1954_v20 }
 0x19d   : > { %v1085_v24 = vmul.f32 %v1084_v23, %v1067_v3  ;;  %v1093_v25 = vrot.slane %v1084_v23, %v1092_v21 }
 0x19f   : > { %v1087_v26 = vrot.slane %v1085_v24, 7  ;;  %v1094_v29 = vmul.f32 %v1093_v25, %v1047_v55  ;;  %v1095_v30 = vmul.f32 %v1093_v25, %v1048_v56  ;;  %v1272_v24 = vsub.s32 4, %v1949_v19 }
 0x1a1   : > { %v1089_v28 = vsub.f32 %v1954_v20, %v1087_v26  ;;  %v1273_v25 = vrot.slane %v1954_v20, %v1272_v24 }
 0x1a3   : > { %v1099_v31 = vrot.slane %v1089_v28, %v1098_v27 }
 0x1a5   : > { %v1100_v32 = vadd.f32 %v1099_v31, %v1094_v29  ;;  %v1101_v33 = vadd.f32 %v1099_v31, %v1095_v30 }
 0x1a7   : > { %v1102_v34 = vmax.f32 %v1100_v32, 0.0  ;;  %v1103_v35 = vmax.f32 %v1101_v33, 0.0 }
 0x1a9   : > { %v1104_v36 = vpack.c.bf16 %v1103_v35, %v1102_v34 }
 0x1ab   : > { %1640 = vmatmul.mubr.bf16.vlgmr.msra.gmra.mrb[0].mxu0 %v1104_v36 }
 0x27e   : > { %v1203_v41 = vpop.f32.mrb[0].mxu0 }
 0x27f   : > { %v1641_v42 = vpop.f32.mrb[1].mxu0  ;;  %v1213_v44 = vsel %vm1212_vm2, %v1203_v41, 0.0 }
 0x280   : > { %v1206_v43 = vpop.f32.mrb[2].mxu0 }
 0x281   : > { %v1214_v45 = vsel %vm1212_vm2, %v1206_v43, 0.0  ;;  %v1642_v46 = vpop.f32.mrb[3].mxu0 }
 0x282   : > { %v1215_v47 = vadd.f32 %v1214_v45, %v1213_v44 }
 0x284   : > { %v1216_v48 = vrot.slane %v1215_v47, 4 }
 0x286   : > { %v1217_v49 = vadd.f32 %v1216_v48, %v1215_v47 }
 0x288   : > { %v1218_v50 = vrot.slane %v1217_v49, 2 }
 0x28a   : > { %v1219_v52 = vadd.f32 %v1218_v50, %v1217_v49 }
 0x28c   : > { %v1220_v51 = vrot.slane %v1219_v52, 1 }
 0x28e   : > { %v1221_v53 = vadd.f32 %v1220_v51, %v1219_v52 }
 0x290   : > { %v1222_v54 = vmul.f32 0.0625, %v1221_v53 }
 0x292   : > { %v1223_v55 = vsub.f32 %v1203_v41, %v1222_v54  ;;  %v1224_v56 = vsub.f32 %v1206_v43, %v1222_v54 }
 0x294   : > { %v1227_v57 = vmul.f32 %v1223_v55, %v1223_v55  ;;  %v1228_v58 = vmul.f32 %v1224_v56, %v1224_v56 }
 0x296   : > { %v1229_v59 = vsel %vm1212_vm2, %v1227_v57, 0.0  ;;  %v1230_v60 = vsel %vm1212_vm2, %v1228_v58, 0.0 }
 0x297   : > { %v1231_v61 = vadd.f32 %v1230_v60, %v1229_v59 }
 0x299   : > { %v1232_v62 = vrot.slane %v1231_v61, 4 }
 0x29b   : > { %v1233_v63 = vadd.f32 %v1232_v62, %v1231_v61 }
 0x29d   : > { %v1234_v0 = vrot.slane %v1233_v63, 2 }
 0x29f   : > { %v1235_v1 = vadd.f32 %v1234_v0, %v1233_v63 }
 0x2a1   : > { %v1236_v2 = vrot.slane %v1235_v1, 1 }
 0x2a3   : > { %v1237_v3 = vadd.f32 %v1236_v2, %v1235_v1 }
 0x2a5   : > { %v1238_v4 = vmul.f32 0.0625, %v1237_v3 }
 0x2a7   : > { %v1239_v5 = vadd.f32 1e-05, %v1238_v4 }
 0x2a9   : > { %1776 = vrsqrt.f32 %v1239_v5 }
 0x2b3   : > { %v1777_v7 = vpop.eup %1776 }
 0x2b4   : > { %v1241_v8 = vmul.f32 %v1777_v7, %v1954_v20 }
 0x2b6   : > { %v1242_v9 = vmul.f32 %v1241_v8, %v1222_v54  ;;  %v1250_v10 = vrot.slane %v1241_v8, %v1249_v6 }
 0x2b8   : > { %v1244_v11 = vrot.slane %v1242_v9, 7  ;;  %v1251_v12 = vmul.f32 %v1250_v10, %v1203_v41  ;;  %v1252_v13 = vmul.f32 %v1250_v10, %v1206_v43 }
 0x2ba   : > { %v1246_v15 = vsub.f32 %v1954_v20, %v1244_v11 }
 0x2bc   : > { %v1256_v16 = vrot.slane %v1246_v15, %v1255_v14 }
 0x2be   : > { %v1257_v17 = vadd.f32 %v1256_v16, %v1251_v12  ;;  %v1258_v18 = vadd.f32 %v1256_v16, %v1252_v13 }
 0x2c0   : > { %v1260_v21 = vmax.f32 %v1258_v18, 0.0  ;;  %v1259_v22 = vmax.f32 %v1257_v17, 0.0 }
 0x2c2   : > { %v1261_v23 = vpack.c.bf16 %v1260_v21, %v1259_v22 }
 0x2c4   : > { %1652 = vmatmul.mubr.msk.bf16.vlgmr.msra.gmra.mrb[0].mxu1 %vm1212_vm2, %v1261_v23 }
 0x397   : > { %v1335_v26 = vpop.f32.mrb[0].mxu1 }
 0x398   : > { %v1336_v27 = vadd.f32 %v1335_v26, %v1273_v25  ;;  %v1653_v28 = vpop.f32.mrb[1].mxu1 }
 0x399   : > { %v1338_v29 = vpop.f32.mrb[2].mxu1 }
 0x39a   : > { %1343 = vst.msk [vmem:[%s2000_s5] sm:$0xff] %vm1342_vm3, %v1336_v27  ;;  %v1339_v30 = vadd.f32 %v1338_v29, %v1273_v25  ;;  %v1654_v31 = vpop.f32.mrb[3].mxu1 }
 0x39c   : > { %1344 = vst.msk [vmem:[%s2000_s5 + $0x8] sm:$0xff] %vm1342_vm3, %v1339_v30 }
 0x39d PF: > { %s16_s18 = sadd.s32 1, %s1816_s18  }
 0x39e   : > { %p13_p5 = scmp.ge.s32.totalorder %s16_s18, 4  }
 0x3a0   :  { %15 = sbr.rel (!%p13_p5) target bundleno = 1 (0x1), region = 76 }
 0x3a7   :  { %1356 = vsyncpa [#allocation4], 1 }
 0x3a8   :  { %1358 = vsyncpa [#allocation4 + $0x1], 1 }

</bundles_post_ra>
